<compile_context>
chip_gen: v6e
topology: v6e:2x2x1
jax: 0.10.0
libtpu: 0.0.40
codegen_flags: <defaults>
</compile_context>

<pallas_src>
import jax
import jax.numpy as jnp
from jax import lax
from jax.experimental import pallas as pl
from jax.experimental.pallas import tpu as pltpu

STATE_DIM = 4      # CartPole observation_space.shape[0]
ACTION_DIM = 2     # CartPole action_space.n
HIDDEN = 128

OUT_ROWS = 8                       # action_dim padded to one sublane tile
W_SLAB_ROWS = HIDDEN + OUT_ROWS    # 136: rows [0:128)=W2, rows [128:136)=W3^T
AUX_ROWS = 16                      # rows 0-3=W1 (f32), 4=b1, 5=b2,
                                   # rows 8-15 lane 0 = b3 as an (8,1) column


def qnetwork_kernel(x_ref, w_ref, aux_ref, o_ref):
    """Fused 3-layer MLP on one (TB, STATE_DIM) batch tile.

    x_ref:   (TB, 4)    f32   raw states (no feature padding).
    w_ref:   (136, 128) bf16  rows [0:128)=W2, rows [128:136)=W3^T (rows>=2 zero).
    aux_ref: (16, 128)  f32   rows 0-3=W1, row 4=b1, row 5=b2,
                              rows 8-15 lane 0 = b3 column.
    o_ref:   (8, TB)    f32   transposed lane-dense Q-values (rows >= 2 unused).
    """
    x = x_ref[...]                                     # (TB, 4) f32

    # ---- Layer 1 (K=4): four broadcast FMAs on the VPU, all in f32. ----
    h1 = aux_ref[4:5, :]                               # b1, (1, 128)
    for k in range(STATE_DIM):                         # static unroll
        h1 = h1 + x[:, k:k + 1] * aux_ref[k:k + 1, :]
    h1 = jnp.maximum(h1, 0.0)                          # (TB, 128) f32

    # ---- Layer 2: (TB,128) @ (128,128) on the MXU, bf16 in / f32 acc. ----
    w2 = w_ref[0:HIDDEN, :]                            # (128, 128) bf16
    h2 = jnp.dot(h1.astype(jnp.bfloat16), w2,
                 preferred_element_type=jnp.float32) + aux_ref[5:6, :]
    h2 = jnp.maximum(h2, 0.0)                          # (TB, 128) f32

    # ---- Layer 3, transposed: (8,128) . (TB,128)^T -> (8, TB) lane-dense. ----
    w3t = w_ref[HIDDEN:W_SLAB_ROWS, :]                 # (8, 128) bf16
    out_t = lax.dot_general(
        w3t, h2.astype(jnp.bfloat16),
        dimension_numbers=(((1,), (1,)), ((), ())),
        preferred_element_type=jnp.float32)            # (8, TB) f32
    out_t = out_t + aux_ref[8:AUX_ROWS, 0:1]           # + b3 as an (8,1) column
    o_ref[...] = out_t.astype(o_ref.dtype)


def _round_up(n, m):
    return ((n + m - 1) // m) * m


def qnetwork_forward(x, w_slab, aux_slab, *, batch_tile=2048,
                     small_batch_max=128):
    """Q(s) for a batch of states.  x: (B, STATE_DIM) -> (B, ACTION_DIM) f32.

    Wrap this (or the surrounding act/train step) in jax.jit so the tail pad,
    pallas_call, slice and transpose fuse into a single dispatch.
    """
    B = x.shape[0]
    x = x.astype(jnp.float32)

    if B <= small_batch_max:
        # --- small-batch acting path: single invocation, no grid ---
        flops = 2 * B * (STATE_DIM * HIDDEN + HIDDEN * HIDDEN
                         + HIDDEN * OUT_ROWS)
        bytes_accessed = (x.size * 4 + w_slab.size * 2 + aux_slab.size * 4
                          + OUT_ROWS * B * 4)
        out_t = pl.pallas_call(
            qnetwork_kernel,
            out_shape=jax.ShapeDtypeStruct((OUT_ROWS, B), jnp.float32),
            cost_estimate=pl.CostEstimate(flops=flops, transcendentals=0,
                                          bytes_accessed=bytes_accessed),
        )(x, w_slab, aux_slab)
        return out_t[:ACTION_DIM, :].T

    # --- large-batch training path: batch-tiled grid, weights VMEM-resident ---
    # Pick the tile so there are >=2 tiles (so dimension_semantics=("parallel",)
    # can shard across v7x's two TensorCores) but never above batch_tile.
    # Keep batch_tile <= 4096 on v7x (32 MiB scoped-VMEM default).
    tb = min(batch_tile, max(128, _round_up(pl.cdiv(B, 2), 128)))
    num_tiles = pl.cdiv(B, tb)
    Bp = num_tiles * tb
    x_p = x if Bp == B else jnp.zeros((Bp, STATE_DIM), jnp.float32).at[:B].set(x)

    out_t = pl.pallas_call(
        qnetwork_kernel,
        out_shape=jax.ShapeDtypeStruct((OUT_ROWS, Bp), jnp.float32),
        grid=(num_tiles,),
        in_specs=[
            pl.BlockSpec((tb, STATE_DIM), lambda i: (i, 0)),
            pl.BlockSpec((W_SLAB_ROWS, HIDDEN), lambda i: (0, 0)),   # resident
            pl.BlockSpec((AUX_ROWS, HIDDEN), lambda i: (0, 0)),      # resident
        ],
        out_specs=pl.BlockSpec((OUT_ROWS, tb), lambda i: (0, i)),
        compiler_params=pltpu.CompilerParams(
            dimension_semantics=("parallel",)),
    )(x_p, w_slab, aux_slab)
    # Padded tail columns carry bias-propagated junk; always slice before use.
    return out_t[:ACTION_DIM, :B].T


def init_params(key):
    """PyTorch-style init: U(-1/sqrt(fan_in)).  Weights stored transposed vs.
    torch.nn.Linear, i.e. (in_features, out_features), so y = x @ W + b."""
    keys = jax.random.split(key, 6)

    def lin(kw, kb, fan_in, fan_out):
        bound = 1.0 / float(fan_in) ** 0.5
        w = jax.random.uniform(kw, (fan_in, fan_out), jnp.float32,
                               minval=-bound, maxval=bound)
        b = jax.random.uniform(kb, (1, fan_out), jnp.float32,
                               minval=-bound, maxval=bound)
        return w, b

    w1, b1 = lin(keys[0], keys[1], STATE_DIM, HIDDEN)
    w2, b2 = lin(keys[2], keys[3], HIDDEN, HIDDEN)
    w3, b3 = lin(keys[4], keys[5], HIDDEN, ACTION_DIM)
    return (w1, b1, w2, b2, w3, b3)


def pack_params(params):
    """Pack into one bf16 weight slab (W2 + W3^T) and one f32 aux slab
    (W1 + b1 + b2 + b3-column)."""
    w1, b1, w2, b2, w3, b3 = params

    w3t = jnp.zeros((OUT_ROWS, HIDDEN), jnp.float32).at[:ACTION_DIM, :].set(w3.T)
    w_slab = jnp.concatenate([w2, w3t], axis=0).astype(jnp.bfloat16)  # (136,128)

    aux = jnp.zeros((AUX_ROWS, HIDDEN), jnp.float32)
    aux = aux.at[0:STATE_DIM, :].set(w1)              # rows 0-3: W1 (f32)
    aux = aux.at[4, :].set(b1[0])                     # row 4: b1
    aux = aux.at[5, :].set(b2[0])                     # row 5: b2
    aux = aux.at[8:8 + ACTION_DIM, 0].set(b3[0])      # rows 8-9, lane 0: b3
    return w_slab, aux


def reference_forward(x, params):
    """Pure-JAX reference mirroring the kernel numerics (f32 layer 1, bf16
    matmul inputs for layers 2/3, f32 accumulation)."""
    w1, b1, w2, b2, w3, b3 = params
    x = x.astype(jnp.float32)
    bf = jnp.bfloat16

    h1 = jnp.maximum(jnp.dot(x, w1) + b1, 0.0)
    h2 = jnp.maximum(
        jnp.dot(h1.astype(bf), w2.astype(bf),
                preferred_element_type=jnp.float32) + b2, 0.0)
    out = jnp.dot(h2.astype(bf), w3.astype(bf),
                  preferred_element_type=jnp.float32) + b3
    return out


if __name__ == "__main__":
    key = jax.random.PRNGKey(0)
    k_params, k_x1, k_x2 = jax.random.split(key, 3)

    params = init_params(k_params)
    w_slab, aux_slab = pack_params(params)

    fwd = jax.jit(qnetwork_forward,
                  static_argnames=("batch_tile", "small_batch_max"))

    # Small acting-path batch -> gridless single-invocation kernel.
    x_small = jax.random.normal(k_x1, (8, STATE_DIM), jnp.float32)
    q_small = jax.block_until_ready(fwd(x_small, w_slab, aux_slab))
    ref_small = reference_forward(x_small, params)
    assert q_small.shape == (8, ACTION_DIM)
    assert jnp.allclose(q_small, ref_small, atol=1e-2, rtol=1e-2)

    # Training-style batch (non-multiple of the tile) -> batch-tiled grid path
    # (B=200 -> tb=128, 2 grid tiles, exercises tail padding + slicing).
    x_big = jax.random.normal(k_x2, (200, STATE_DIM), jnp.float32)
    q_big = jax.block_until_ready(fwd(x_big, w_slab, aux_slab))
    ref_big = reference_forward(x_big, params)
    assert q_big.shape == (200, ACTION_DIM)
    assert jnp.allclose(q_big, ref_big, atol=1e-2, rtol=1e-2)

    print("KERNEL_OK")
</pallas_src>

<mosaic_0001>
module attributes {stable_mosaic.version = 11 : i64} {
  func.func @qnetwork_kernel(%arg0: memref<8x4xf32, #tpu.memory_space<vmem>>, %arg1: memref<136x128xbf16, #tpu.memory_space<vmem>>, %arg2: memref<16x128xf32, #tpu.memory_space<vmem>>, %arg3: memref<8x8xf32, #tpu.memory_space<vmem>>) attributes {dimension_semantics = [], scalar_prefetch = 0 : i64, scratch_operands = 0 : i64, tpu.core_type = #tpu.core_type<tc>} {
    %c0 = arith.constant 0 : index
    %c0_0 = arith.constant 0 : index
    %0 = vector.load %arg0[%c0, %c0_0] : memref<8x4xf32, #tpu.memory_space<vmem>>, vector<8x4xf32>
    %c4 = arith.constant 4 : index
    %c0_1 = arith.constant 0 : index
    %1 = vector.load %arg2[%c4, %c0_1] : memref<16x128xf32, #tpu.memory_space<vmem>>, vector<1x128xf32>
    %2 = vector.extract_strided_slice %0 {offsets = [0, 0], sizes = [8, 1], strides = [1, 1]} : vector<8x4xf32> to vector<8x1xf32>
    %c0_2 = arith.constant 0 : index
    %c0_3 = arith.constant 0 : index
    %3 = vector.load %arg2[%c0_2, %c0_3] : memref<16x128xf32, #tpu.memory_space<vmem>>, vector<1x128xf32>
    %4 = vector.broadcast %2 : vector<8x1xf32> to vector<8x128xf32>
    %5 = vector.broadcast %3 : vector<1x128xf32> to vector<8x128xf32>
    %6 = arith.mulf %4, %5 : vector<8x128xf32>
    %7 = vector.broadcast %1 : vector<1x128xf32> to vector<8x128xf32>
    %8 = arith.addf %7, %6 : vector<8x128xf32>
    %9 = vector.extract_strided_slice %0 {offsets = [0, 1], sizes = [8, 1], strides = [1, 1]} : vector<8x4xf32> to vector<8x1xf32>
    %c1 = arith.constant 1 : index
    %c0_4 = arith.constant 0 : index
    %10 = vector.load %arg2[%c1, %c0_4] : memref<16x128xf32, #tpu.memory_space<vmem>>, vector<1x128xf32>
    %11 = vector.broadcast %9 : vector<8x1xf32> to vector<8x128xf32>
    %12 = vector.broadcast %10 : vector<1x128xf32> to vector<8x128xf32>
    %13 = arith.mulf %11, %12 : vector<8x128xf32>
    %14 = arith.addf %8, %13 : vector<8x128xf32>
    %15 = vector.extract_strided_slice %0 {offsets = [0, 2], sizes = [8, 1], strides = [1, 1]} : vector<8x4xf32> to vector<8x1xf32>
    %c2 = arith.constant 2 : index
    %c0_5 = arith.constant 0 : index
    %16 = vector.load %arg2[%c2, %c0_5] : memref<16x128xf32, #tpu.memory_space<vmem>>, vector<1x128xf32>
    %17 = vector.broadcast %15 : vector<8x1xf32> to vector<8x128xf32>
    %18 = vector.broadcast %16 : vector<1x128xf32> to vector<8x128xf32>
    %19 = arith.mulf %17, %18 : vector<8x128xf32>
    %20 = arith.addf %14, %19 : vector<8x128xf32>
    %21 = vector.extract_strided_slice %0 {offsets = [0, 3], sizes = [8, 1], strides = [1, 1]} : vector<8x4xf32> to vector<8x1xf32>
    %c3 = arith.constant 3 : index
    %c0_6 = arith.constant 0 : index
    %22 = vector.load %arg2[%c3, %c0_6] : memref<16x128xf32, #tpu.memory_space<vmem>>, vector<1x128xf32>
    %23 = vector.broadcast %21 : vector<8x1xf32> to vector<8x128xf32>
    %24 = vector.broadcast %22 : vector<1x128xf32> to vector<8x128xf32>
    %25 = arith.mulf %23, %24 : vector<8x128xf32>
    %26 = arith.addf %20, %25 : vector<8x128xf32>
    %cst = arith.constant 0.000000e+00 : f32
    %27 = vector.broadcast %cst : f32 to vector<8x128xf32>
    %28 = arith.maximumf %26, %27 : vector<8x128xf32>
    %c0_7 = arith.constant 0 : index
    %c0_8 = arith.constant 0 : index
    %29 = vector.load %arg1[%c0_7, %c0_8] : memref<136x128xbf16, #tpu.memory_space<vmem>>, vector<128x128xbf16>
    %30 = arith.truncf %28 : vector<8x128xf32> to vector<8x128xbf16>
    %cst_9 = arith.constant dense<0.000000e+00> : vector<8x128xf32>
    %31 = tpu.matmul %30, %29, %cst_9 {dimension_numbers = #tpu.dot_dimension_numbers<[1], [0], [0], [1], [0, 0, 1, 1], [], []>} : vector<8x128xbf16>, vector<128x128xbf16>, vector<8x128xf32> -> vector<8x128xf32>
    %c5 = arith.constant 5 : index
    %c0_10 = arith.constant 0 : index
    %32 = vector.load %arg2[%c5, %c0_10] : memref<16x128xf32, #tpu.memory_space<vmem>>, vector<1x128xf32>
    %33 = vector.broadcast %32 : vector<1x128xf32> to vector<8x128xf32>
    %34 = arith.addf %31, %33 : vector<8x128xf32>
    %cst_11 = arith.constant 0.000000e+00 : f32
    %35 = vector.broadcast %cst_11 : f32 to vector<8x128xf32>
    %36 = arith.maximumf %34, %35 : vector<8x128xf32>
    %c128 = arith.constant 128 : index
    %c0_12 = arith.constant 0 : index
    %37 = vector.load %arg1[%c128, %c0_12] : memref<136x128xbf16, #tpu.memory_space<vmem>>, vector<8x128xbf16>
    %38 = arith.truncf %36 : vector<8x128xf32> to vector<8x128xbf16>
    %cst_13 = arith.constant dense<0.000000e+00> : vector<8x8xf32>
    %39 = tpu.matmul %37, %38, %cst_13 {dimension_numbers = #tpu.dot_dimension_numbers<[1], [1], [0], [0], [0, 0, 1, 0], [], []>} : vector<8x128xbf16>, vector<8x128xbf16>, vector<8x8xf32> -> vector<8x8xf32>
    %c8 = arith.constant 8 : index
    %c0_14 = arith.constant 0 : index
    %40 = vector.load %arg2[%c8, %c0_14] : memref<16x128xf32, #tpu.memory_space<vmem>>, vector<8x1xf32>
    %41 = vector.broadcast %40 : vector<8x1xf32> to vector<8x8xf32>
    %42 = arith.addf %39, %41 : vector<8x8xf32>
    %c0_15 = arith.constant 0 : index
    %c0_16 = arith.constant 0 : index
    %43 = vector.load %arg3[%c0_15, %c0_16] : memref<8x8xf32, #tpu.memory_space<vmem>>, vector<8x8xf32>
    tpu.vector_store %arg3[%c0_15, %c0_16], %42 {strides = array<i32>} : memref<8x8xf32, #tpu.memory_space<vmem>>, vector<8x8xf32>,
    return
  }
}

</mosaic_0001>

<bundles_post_ra>
// kernel: qnetwork_forward.1
= control target key start
LH: loop header
LB: loop body
LE: loop exit
PB: predicated region body
PF: predicated region fallthrough
CT: control target
= control target key end

     0   :  { %8 = vsyncpa [#allocation3], 0  ;;  %s427_s0 = inlined_call_operand.vmem [shape: f32[8,4], index: 0, kind: input, shape index: {}]   ;;  %s428_s1 = inlined_call_operand.hbm [shape: bf16[136,128], index: 1, kind: input, shape index: {}]   ;;  %s429_s2 = inlined_call_operand.hbm [shape: f32[16,128], index: 2, kind: input, shape index: {}]   ;;  %s430_s3 = inlined_call_operand.vmem [shape: f32[8,8], index: 3, kind: output, shape index: {}]  }
   0x1   :  { %9 = vsyncpa [#allocation5], 0  ;;  %s383_s12 = smov [#allocation2]  }
   0x2   :  { %s17_s13 = sshll.u32 %s383_s12, 4  ;;  %s18_s13 = int_to_ptr.vmem [resolvable:$true] %s17_s13 }
   0x3   :  { %s347_s14 = scalar_lea.vmem %s18_s13, 1088  ;;  %p352_p1 = scmp.lt.s32.totalorder %s18_s13, %s18_s13 }
   0x4   :  { %p348_p0 = scmp.ne.s32.totalorder %s18_s13, %s347_s14  ;;  %p353_p2 = scmp.lt.s32.totalorder %s347_s14, %s347_s14 }
   0x6   :  { %p354_p3 = por %p353_p2, %p352_p1 }
   0x8   :  { %p355_p4 = pnand %p354_p3, %p348_p0 }
   0xa   :  { %358 = shalt.err (!%p355_p4)
}
   0xb   :  { %s384_s15 = smov 64   ;;  %s385_s16 = smov 4  }
   0xc   :  { %23 = dma.hbm_to_vmem [thread:$0]  %s428_s1, 1088, %s18_s13, [#allocation3], %s384_s15, %s384_s15, %s385_s16  }
   0xd   :  { %s386_s19 = smov [#allocation4]  }
   0xe   :  { %s29_s20 = sshll.u32 %s386_s19, 4  ;;  %s30_s20 = int_to_ptr.vmem [resolvable:$true] %s29_s20 }
   0xf   :  { %s367_s21 = scalar_lea.vmem %s30_s20, 256  ;;  %p372_p6 = scmp.lt.s32.totalorder %s30_s20, %s30_s20 }
  0x10   :  { %p368_p5 = scmp.ne.s32.totalorder %s30_s20, %s367_s21  ;;  %p373_p7 = scmp.lt.s32.totalorder %s367_s21, %s367_s21 }
  0x12   :  { %p374_p8 = por %p373_p7, %p372_p6 }
  0x14   :  { %p375_p9 = pnand %p374_p8, %p368_p5 }
  0x16   :  { %378 = shalt.err (!%p375_p9)
}
  0x17   :  { %s387_s22 = smov 128   ;;  %s388_s23 = smov 8  }
  0x18   :  { %35 = dma.hbm_to_vmem [thread:$0]  %s429_s2, 256, %s30_s20, [#allocation5], %s387_s22, %s387_s22, %s388_s23  }
  0x19   :  { %379 = dma.done.wait [#allocation3], 1088  }
  0x1a   :  { %380 = vsyncadd [#allocation3], 4294966208 }
  0x1b   :  { %381 = dma.done.wait [#allocation5], 256  }
  0x1c   :  { %382 = vsyncadd [#allocation5], 4294967040  ;;  %v389_v0 = vmov 0   ;;  %v390_v1 = vmov 2   ;;  %v391_v2 = vmov 0.0   ;;  %v43_v3 = vld [vmem:[%s427_s0] sm:$0xff] }
  0x1d   :  { %325 = vset.pattern.permute.xlu0 %v389_v0  ;;  %327 = vset.pattern.permute.xlu1 %v390_v1  ;;  %v331_v4 = vld [vmem:[#allocation2 + $0x38] sm:$0xff]   ;;  %v332_v5 = vld [vmem:[#allocation2 + $0x30] sm:$0xff]   ;;  %v392_v6 = vmov 1   ;;  %v393_v7 = vmov 3   ;;  %v333_v8 = vld [vmem:[#allocation2 + $0x28] sm:$0xff]   ;;  %vm394_vm0 = vmmov 0  }
  0x1e   :  { %287 = vmatprep.subr.bf16.mxu0 %v391_v2  ;;  %307 = vmatprep.subr.bf16.mxu1 %v391_v2  ;;  %v334_v9 = vld [vmem:[#allocation2 + $0x20] sm:$0xff]   ;;  %v335_v10 = vld [vmem:[#allocation2 + $0x18] sm:$0xff]   ;;  %v336_v11 = vld [vmem:[#allocation2 + $0x10] sm:$0xff]   ;;  %vm254_vm1 = vcmask 64512  }
  0x1f   :  { %48 = vperm.xlu0 %325, %v43_v3   ;;  %74 = vperm.xlu1 %327, %v43_v3   ;;  %v337_v12 = vld [vmem:[#allocation2 + $0x8] sm:$0xff]   ;;  %v338_v13 = vld [vmem:[#allocation2] sm:$0xff]  }
  0x20   :  { %288 = vmatpush3.bf16.msra.mxu0 %v331_v4  ;;  %303 = vmatprep.mubr.msk.bf16.mxu0 %vm394_vm0, %v391_v2  ;;  %v262_v14 = vld [vmem:[#allocation4] ss:$0 sm:$0xff]  ;;  %v263_v18 = vld [vmem:[#allocation4 + $0x4] ss:$0 sm:$0xff]  ;;  %v264_v19 = vld [vmem:[#allocation4 + $0x1] ss:$0 sm:$0xff] }
  0x21   :  { %289 = vmatprep.subr.bf16.mxu0 %v391_v2  ;;  %309 = vmatprep.mubr.msk.bf16.mxu1 %vm394_vm0, %v391_v2  ;;  %v265_v20 = vld [vmem:[#allocation4 + $0x2] ss:$0 sm:$0xff]  ;;  %v266_v22 = vld [vmem:[#allocation4 + $0x3] ss:$0 sm:$0xff]  ;;  %v208_v33 = vld [vmem:[#allocation4 + $0x8] sm:$0xff] }
  0x22   :  { %v267_v34 = vld [vmem:[#allocation4 + $0x5] ss:$0 sm:$0xff]  ;;  %v206_v42 = vld [vmem:[#allocation2 + $0x40] sm:$0xf] }
  0x23   :  { %326 = vset.pattern.permute.xlu0 %v392_v6  ;;  %328 = vset.pattern.permute.xlu1 %v393_v7 }
  0x24   :  { %63 = vperm.xlu0 %326, %v43_v3   ;;  %85 = vperm.xlu1 %328, %v43_v3  }
  0x25   :  { %290 = vmatpush3.bf16.msra.mxu0 %v332_v5 }
  0x26   :  { %291 = vmatprep.subr.bf16.mxu0 %v391_v2 }
  0x28   :  { %329 = vset.pattern.permute.xlu1 %v389_v0  ;;  %330 = vset.pattern.permute.xlu0 %v389_v0 }
  0x29   :  { %292 = vmatpush3.bf16.msra.mxu0 %v333_v8  ;;  %211 = vperm.xlu1 %329, %v208_v33  }
  0x2a   :  { %293 = vmatprep.subr.bf16.mxu0 %v391_v2 }
  0x2d   :  { %294 = vmatpush3.bf16.msra.mxu0 %v334_v9 }
  0x2e   :  { %295 = vmatprep.subr.bf16.mxu0 %v391_v2 }
  0x31   :  { %296 = vmatpush3.bf16.msra.mxu0 %v335_v10 }
  0x32   :  { %297 = vmatprep.subr.bf16.mxu0 %v391_v2 }
  0x35   :  { %298 = vmatpush3.bf16.msra.mxu0 %v336_v11 }
  0x36   :  { %299 = vmatprep.subr.bf16.mxu0 %v391_v2 }
  0x39   :  { %300 = vmatpush3.bf16.msra.mxu0 %v337_v12 }
  0x3a   :  { %301 = vmatprep.subr.bf16.mxu0 %v391_v2 }
  0x3d   :  { %302 = vmatpush3.bf16.msra.mxu0 %v338_v13 }
  0x9a   :  { %v49_v15 = vpop.permute.xlu0 %48  ;;  %v75_v16 = vpop.permute.xlu1 %74 }
  0x9b   :  { %v55_v17 = vmul.f32 %v262_v14, %v49_v15  ;;  %v81_v26 = vmul.f32 %v265_v20, %v75_v16 }
  0x9d   :  { %v60_v24 = vadd.f32 %v263_v18, %v55_v17 }
  0x9f   :  { %v64_v21 = vpop.permute.xlu0 %63  ;;  %v86_v23 = vpop.permute.xlu1 %85 }
  0xa0   :  { %v70_v25 = vmul.f32 %v264_v19, %v64_v21  ;;  %v92_v28 = vmul.f32 %v266_v22, %v86_v23 }
  0xa2   :  { %v71_v27 = vadd.f32 %v70_v25, %v60_v24 }
  0xa4   :  { %v82_v29 = vadd.f32 %v81_v26, %v71_v27  ;;  %v212_v43 = vpop.permute.xlu1 %211 }
  0xa6   :  { %v93_v30 = vadd.f32 %v92_v28, %v82_v29 }
  0xa8   :  { %v94_v31 = vmax.f32 %v93_v30, 0.0 }
  0xaa   :  { %v111_v32 = vpack.c.bf16 %v94_v31, %v94_v31 }
  0xac   :  { %304 = vmatmul.mubr.bf16.vlgmr.msra.gmra.mxu0 %v111_v32 }
 0x16c   :  { %v199_v35 = vpop.f32.mrf.mxu0 }
 0x16d   :  { %v200_v36 = vadd.f32 %v267_v34, %v199_v35 }
 0x16e   :  { %v305_v37 = vpop.f32.mrf.mxu0 }
 0x16f   :  { %v205_v38 = vmax.f32 %v200_v36, 0.0 }
 0x170   :  { %v202_v39 = vpop.f32.mrf.mxu0 }
 0x171   :  { %v207_v40 = vpack.c.bf16 %v205_v38, %v205_v38 }
 0x172   :  { %v306_v41 = vpop.f32.mrf.mxu0 }
 0x173   :  { %308 = vmatpush3.bf16.xpose.msra.mxu1 %v207_v40 }
 0x17a   :  { %310 = vmatmul.mubr.bf16.vlgmr.msra.gmra.mxu1 %v206_v42 }
 0x23a   :  { %v248_v44 = vpop.f32.mrf.mxu1 }
 0x23b   :  { %v249_v45 = vadd.f32 %v248_v44, %v212_v43 }
 0x23c   :  { %v311_v46 = vpop.f32.mrf.mxu1 }
 0x23d   :  { %255 = vst.msk [vmem:[%s430_s3] sm:$0xff] %vm254_vm1, %v249_v45 }
 0x23e   :  { %v251_v47 = vpop.f32.mrf.mxu1 }
 0x240   :  { %v312_v48 = vpop.f32.mrf.mxu1 }
 0x241   :  { %260 = vsyncpa [#allocation3], 1 }
 0x242   :  { %261 = vsyncpa [#allocation5], 1 }

</bundles_post_ra>
